<compile_context>
chip_gen: v7x
topology: tpu7x:2x2x1
jax: 0.10.0
libtpu: 0.0.40
codegen_flags: <defaults>
</compile_context>

<pallas_src>
import jax
import jax.numpy as jnp
import numpy as np
from jax import lax
from jax.experimental import pallas as pl
from jax.experimental.pallas import tpu as pltpu

H = 32        # hidden_size
V = 50        # output_size (vocab)
S = 8         # encoder sequence length
V_PAD = 128   # vocab padded to a lane-dense width for the classifier / log-softmax
NEG_INF = -1e30


def _make_kernel(T):
    def kernel(tok_ref,            # SMEM (T,) int32   token ids (scalar prefetch)
               emb_ref,            # (V, H)            embedding table (resident)
               w_gates_ref,        # (2H, 4H)          fused LSTM weights [[W_ih^T],[W_hh^T]]
               b_gates_ref,        # (1, 4H)           combined LSTM bias (i,f,g,o)
               h0_ref, c0_ref,     # (1, H) each
               enc_ref,            # (S, H)            encoder outputs
               w_cls_h_ref,        # (H, V_PAD)        classifier weight, h-part (T, padded)
               w_cls_c_ref,        # (H, V_PAD)        classifier weight, ctx-part
               b_cls_ref,          # (1, V_PAD)        classifier bias (pad lanes = -1e30)
               logp_ref,           # (T, V_PAD) out    per-step log-probs (padded)
               hT_ref, cT_ref,     # (1, H) out        final hidden / cell state
               attn_ref):          # (T, S) out        per-step attention weights
        emb = emb_ref[...]
        w_gates = w_gates_ref[...]
        b_gates = b_gates_ref[...]
        enc = enc_ref[...]
        w_cls_h = w_cls_h_ref[...]
        w_cls_c = w_cls_c_ref[...]
        b_cls = b_cls_ref[...]

        h = h0_ref[...]
        c = c0_ref[...]

        # Fully unrolled short fixed-T step loop (equivalent to
        # lax.fori_loop(..., unroll=True) for this trip count; static indices
        # keep every row store static / unmasked-friendly).
        for t in range(T):
            tok = tok_ref[t]

            # Embedding lookup from the resident table via one-hot matmul.
            # TODO(synk): dropout is stochastic; eval-mode identity used here.
            onehot = (lax.broadcasted_iota(jnp.int32, (1, V), 1) == tok
                      ).astype(jnp.float32)
            x = jnp.dot(onehot, emb, preferred_element_type=jnp.float32)      # (1, H)

            # ---- single-step LSTM: one fused MXU op for all 4 gates ----
            xh = jnp.concatenate([x, h], axis=-1)                             # (1, 2H)
            gates = jnp.dot(xh, w_gates,
                            preferred_element_type=jnp.float32) + b_gates     # (1, 4H)
            i_g = jax.nn.sigmoid(gates[:, 0 * H:1 * H])
            f_g = jax.nn.sigmoid(gates[:, 1 * H:2 * H])
            g_g = jnp.tanh(gates[:, 2 * H:3 * H])
            o_g = jax.nn.sigmoid(gates[:, 3 * H:4 * H])
            c = f_g * c + i_g * g_g
            h = o_g * jnp.tanh(c)

            # ---- Luong "dot" attention: scores = h @ enc^T, softmax over seq ----
            scores = lax.dot_general(h, enc, (((1,), (1,)), ((), ())),
                                     preferred_element_type=jnp.float32)      # (1, S)
            m = jnp.max(scores, axis=-1, keepdims=True)
            e = jnp.exp(scores - m)
            attn = e * pl.reciprocal(jnp.sum(e, axis=-1, keepdims=True),
                                     approx=False)
            ctx = jnp.dot(attn, enc, preferred_element_type=jnp.float32)      # (1, H)

            # ---- classifier (split dots, no concat) + log-softmax ----
            logits = (jnp.dot(h, w_cls_h, preferred_element_type=jnp.float32)
                      + jnp.dot(ctx, w_cls_c, preferred_element_type=jnp.float32)
                      + b_cls)                                                # (1, V_PAD)
            lm = jnp.max(logits, axis=-1, keepdims=True)
            el = jnp.exp(logits - lm)
            lse = jnp.log(jnp.sum(el, axis=-1, keepdims=True)) + lm

            logp_ref[t:t + 1, :] = logits - lse
            attn_ref[t:t + 1, :] = attn

        hT_ref[...] = h
        cT_ref[...] = c

    return kernel


def luong_decoder_forward(tokens, hidden, encoder_outputs, params):
    """Runs T teacher-forced decoder steps in one pallas_call.

    For tokens of shape (1,) this matches LuongDecoder.forward exactly.
    Returns (log_probs (T, V), (hT, cT) each (1, 1, H), attn_weights (T, S)).
    """
    tokens = tokens.reshape(-1).astype(jnp.int32)
    T = int(tokens.shape[0])
    h0, c0 = hidden
    h0_2d = h0.reshape(1, H).astype(jnp.float32)
    c0_2d = c0.reshape(1, H).astype(jnp.float32)
    enc = encoder_outputs.reshape(S, H).astype(jnp.float32)

    # Parameter plumbing (plain-JAX glue, done once per call).
    w_gates = jnp.concatenate([params["w_ih"].T, params["w_hh"].T], axis=0)   # (2H, 4H)
    b_gates = (params["b_ih"] + params["b_hh"]).reshape(1, 4 * H)             # (1, 4H)
    w_cls_h = jnp.zeros((H, V_PAD), jnp.float32).at[:, :V].set(
        params["w_cls"][:, :H].T)                                             # (H, 128)
    w_cls_c = jnp.zeros((H, V_PAD), jnp.float32).at[:, :V].set(
        params["w_cls"][:, H:].T)                                             # (H, 128)
    b_cls = jnp.full((1, V_PAD), NEG_INF, jnp.float32).at[0, :V].set(
        params["b_cls"])                                                      # (1, 128)

    grid_spec = pltpu.PrefetchScalarGridSpec(
        num_scalar_prefetch=1,
        grid=(1,),
        in_specs=[
            pl.BlockSpec((V, H), lambda i, tok: (0, 0)),           # embedding table
            pl.BlockSpec((2 * H, 4 * H), lambda i, tok: (0, 0)),   # fused LSTM weights
            pl.BlockSpec((1, 4 * H), lambda i, tok: (0, 0)),       # fused LSTM bias
            pl.BlockSpec((1, H), lambda i, tok: (0, 0)),           # h0
            pl.BlockSpec((1, H), lambda i, tok: (0, 0)),           # c0
            pl.BlockSpec((S, H), lambda i, tok: (0, 0)),           # encoder outputs
            pl.BlockSpec((H, V_PAD), lambda i, tok: (0, 0)),       # classifier W (h part)
            pl.BlockSpec((H, V_PAD), lambda i, tok: (0, 0)),       # classifier W (ctx part)
            pl.BlockSpec((1, V_PAD), lambda i, tok: (0, 0)),       # classifier bias
        ],
        out_specs=[
            pl.BlockSpec((T, V_PAD), lambda i, tok: (0, 0)),       # log-probs (padded lanes)
            pl.BlockSpec((1, H), lambda i, tok: (0, 0)),           # final h
            pl.BlockSpec((1, H), lambda i, tok: (0, 0)),           # final c
            pl.BlockSpec((T, S), lambda i, tok: (0, 0)),           # attention weights
        ],
    )

    logp_pad, hT, cT, attn = pl.pallas_call(
        _make_kernel(T),
        grid_spec=grid_spec,
        out_shape=[
            jax.ShapeDtypeStruct((T, V_PAD), jnp.float32),
            jax.ShapeDtypeStruct((1, H), jnp.float32),
            jax.ShapeDtypeStruct((1, H), jnp.float32),
            jax.ShapeDtypeStruct((T, S), jnp.float32),
        ],
        compiler_params=pltpu.CompilerParams(dimension_semantics=("arbitrary",)),
    )(tokens, params["emb"], w_gates, b_gates, h0_2d, c0_2d, enc,
      w_cls_h, w_cls_c, b_cls)

    logp = logp_pad[:, :V]
    return logp, (hT.reshape(1, 1, H), cT.reshape(1, 1, H)), attn


def reference_forward(tokens, hidden, encoder_outputs, params):
    """Pure-JAX mirror of the PyTorch forward (eval mode), looped over T steps."""
    h0, c0 = hidden
    h = h0.reshape(1, H)
    c = c0.reshape(1, H)
    enc = encoder_outputs.reshape(S, H)
    logps, attns = [], []
    for t in range(tokens.shape[0]):
        x = params["emb"][tokens[t]][None, :]                                 # (1, H)
        gates = (x @ params["w_ih"].T + params["b_ih"]
                 + h @ params["w_hh"].T + params["b_hh"])                     # (1, 4H)
        i_g, f_g, g_g, o_g = jnp.split(gates, 4, axis=-1)
        i_g = jax.nn.sigmoid(i_g)
        f_g = jax.nn.sigmoid(f_g)
        g_g = jnp.tanh(g_g)
        o_g = jax.nn.sigmoid(o_g)
        c = f_g * c + i_g * g_g
        h = o_g * jnp.tanh(c)
        scores = h @ enc.T                                                    # (1, S)
        attn = jax.nn.softmax(scores, axis=-1)
        ctx = attn @ enc                                                      # (1, H)
        concat = jnp.concatenate([h, ctx], axis=-1)
        logits = concat @ params["w_cls"].T + params["b_cls"]
        logps.append(jax.nn.log_softmax(logits, axis=-1))
        attns.append(attn)
    return (jnp.concatenate(logps, axis=0),
            (h.reshape(1, 1, H), c.reshape(1, 1, H)),
            jnp.concatenate(attns, axis=0))


if __name__ == "__main__":
    key = jax.random.PRNGKey(0)
    ks = jax.random.split(key, 10)
    params = {
        "emb":   0.1 * jax.random.normal(ks[0], (V, H), jnp.float32),
        "w_ih":  0.1 * jax.random.normal(ks[1], (4 * H, H), jnp.float32),
        "w_hh":  0.1 * jax.random.normal(ks[2], (4 * H, H), jnp.float32),
        "b_ih":  0.1 * jax.random.normal(ks[3], (4 * H,), jnp.float32),
        "b_hh":  0.1 * jax.random.normal(ks[4], (4 * H,), jnp.float32),
        "w_cls": 0.1 * jax.random.normal(ks[5], (V, 2 * H), jnp.float32),
        "b_cls": 0.1 * jax.random.normal(ks[6], (V,), jnp.float32),
    }
    h0 = 0.1 * jax.random.normal(ks[7], (1, 1, H), jnp.float32)
    c0 = 0.1 * jax.random.normal(ks[8], (1, 1, H), jnp.float32)
    enc_out = 0.1 * jax.random.normal(ks[9], (1, S, H), jnp.float32)

    # --- single step: exact LuongDecoder.forward semantics (T = 1) ---
    tok1 = jnp.array([7], dtype=jnp.int32)
    logp1, (h1, c1), attn1 = luong_decoder_forward(tok1, (h0, c0), enc_out, params)
    jax.block_until_ready((logp1, h1, c1, attn1))
    r_logp1, (r_h1, r_c1), r_attn1 = reference_forward(tok1, (h0, c0), enc_out, params)
    np.testing.assert_allclose(np.asarray(logp1), np.asarray(r_logp1), rtol=1e-5, atol=1e-5)
    np.testing.assert_allclose(np.asarray(h1), np.asarray(r_h1), rtol=1e-5, atol=1e-5)
    np.testing.assert_allclose(np.asarray(c1), np.asarray(r_c1), rtol=1e-5, atol=1e-5)
    np.testing.assert_allclose(np.asarray(attn1), np.asarray(r_attn1), rtol=1e-5, atol=1e-5)

    # --- T = 8 teacher-forced steps amortized inside one pallas_call ---
    toksT = jnp.array([7, 3, 1, 42, 0, 19, 8, 5], dtype=jnp.int32)
    logpT, (hT, cT), attnT = luong_decoder_forward(toksT, (h0, c0), enc_out, params)
    jax.block_until_ready((logpT, hT, cT, attnT))
    r_logpT, (r_hT, r_cT), r_attnT = reference_forward(toksT, (h0, c0), enc_out, params)
    np.testing.assert_allclose(np.asarray(logpT), np.asarray(r_logpT), rtol=1e-4, atol=1e-4)
    np.testing.assert_allclose(np.asarray(hT), np.asarray(r_hT), rtol=1e-4, atol=1e-4)
    np.testing.assert_allclose(np.asarray(cT), np.asarray(r_cT), rtol=1e-4, atol=1e-4)
    np.testing.assert_allclose(np.asarray(attnT), np.asarray(r_attnT), rtol=1e-4, atol=1e-4)

    print("KERNEL_OK")
</pallas_src>

<mosaic_0001>
module attributes {stable_mosaic.version = 11 : i64} {
  func.func @kernel(%arg0: i32, %arg1: memref<1xi32, #tpu.memory_space<smem>>, %arg2: memref<50x32xf32, #tpu.memory_space<vmem>>, %arg3: memref<64x128xf32, #tpu.memory_space<vmem>>, %arg4: memref<1x128xf32, #tpu.memory_space<vmem>>, %arg5: memref<1x32xf32, #tpu.memory_space<vmem>>, %arg6: memref<1x32xf32, #tpu.memory_space<vmem>>, %arg7: memref<8x32xf32, #tpu.memory_space<vmem>>, %arg8: memref<32x128xf32, #tpu.memory_space<vmem>>, %arg9: memref<32x128xf32, #tpu.memory_space<vmem>>, %arg10: memref<1x128xf32, #tpu.memory_space<vmem>>, %arg11: memref<1x128xf32, #tpu.memory_space<vmem>>, %arg12: memref<1x32xf32, #tpu.memory_space<vmem>>, %arg13: memref<1x32xf32, #tpu.memory_space<vmem>>, %arg14: memref<1x8xf32, #tpu.memory_space<vmem>>) attributes {dimension_semantics = [#tpu.dimension_semantics<arbitrary>], iteration_bounds = array<i64: 1>, scalar_prefetch = 1 : i64, scratch_operands = 0 : i64, tpu.core_type = #tpu.core_type<tc>, window_params = [{pipeline_mode = #tpu.pipeline_mode<synchronous>, transform_indices = @transform_0, window_bounds = array<i64: 50, 32>}, {pipeline_mode = #tpu.pipeline_mode<synchronous>, transform_indices = @transform_1, window_bounds = array<i64: 64, 128>}, {pipeline_mode = #tpu.pipeline_mode<synchronous>, transform_indices = @transform_2, window_bounds = array<i64: 1, 128>}, {pipeline_mode = #tpu.pipeline_mode<synchronous>, transform_indices = @transform_3, window_bounds = array<i64: 1, 32>}, {pipeline_mode = #tpu.pipeline_mode<synchronous>, transform_indices = @transform_4, window_bounds = array<i64: 1, 32>}, {pipeline_mode = #tpu.pipeline_mode<synchronous>, transform_indices = @transform_5, window_bounds = array<i64: 8, 32>}, {pipeline_mode = #tpu.pipeline_mode<synchronous>, transform_indices = @transform_6, window_bounds = array<i64: 32, 128>}, {pipeline_mode = #tpu.pipeline_mode<synchronous>, transform_indices = @transform_7, window_bounds = array<i64: 32, 128>}, {pipeline_mode = #tpu.pipeline_mode<synchronous>, transform_indices = @transform_8, window_bounds = array<i64: 1, 128>}, {pipeline_mode = #tpu.pipeline_mode<synchronous>, transform_indices = @transform_9, window_bounds = array<i64: 1, 128>}, {pipeline_mode = #tpu.pipeline_mode<synchronous>, transform_indices = @transform_10, window_bounds = array<i64: 1, 32>}, {pipeline_mode = #tpu.pipeline_mode<synchronous>, transform_indices = @transform_11, window_bounds = array<i64: 1, 32>}, {pipeline_mode = #tpu.pipeline_mode<synchronous>, transform_indices = @transform_12, window_bounds = array<i64: 1, 8>}]} {
    %c0 = arith.constant 0 : index
    %c0_0 = arith.constant 0 : index
    %0 = vector.load %arg2[%c0, %c0_0] : memref<50x32xf32, #tpu.memory_space<vmem>>, vector<50x32xf32>
    %c0_1 = arith.constant 0 : index
    %c0_2 = arith.constant 0 : index
    %1 = vector.load %arg3[%c0_1, %c0_2] : memref<64x128xf32, #tpu.memory_space<vmem>>, vector<64x128xf32>
    %c0_3 = arith.constant 0 : index
    %c0_4 = arith.constant 0 : index
    %2 = vector.load %arg4[%c0_3, %c0_4] : memref<1x128xf32, #tpu.memory_space<vmem>>, vector<1x128xf32>
    %c0_5 = arith.constant 0 : index
    %c0_6 = arith.constant 0 : index
    %3 = vector.load %arg7[%c0_5, %c0_6] : memref<8x32xf32, #tpu.memory_space<vmem>>, vector<8x32xf32>
    %c0_7 = arith.constant 0 : index
    %c0_8 = arith.constant 0 : index
    %4 = vector.load %arg8[%c0_7, %c0_8] : memref<32x128xf32, #tpu.memory_space<vmem>>, vector<32x128xf32>
    %c0_9 = arith.constant 0 : index
    %c0_10 = arith.constant 0 : index
    %5 = vector.load %arg9[%c0_9, %c0_10] : memref<32x128xf32, #tpu.memory_space<vmem>>, vector<32x128xf32>
    %c0_11 = arith.constant 0 : index
    %c0_12 = arith.constant 0 : index
    %6 = vector.load %arg10[%c0_11, %c0_12] : memref<1x128xf32, #tpu.memory_space<vmem>>, vector<1x128xf32>
    %c0_13 = arith.constant 0 : index
    %c0_14 = arith.constant 0 : index
    %7 = vector.load %arg5[%c0_13, %c0_14] : memref<1x32xf32, #tpu.memory_space<vmem>>, vector<1x32xf32>
    %c0_15 = arith.constant 0 : index
    %c0_16 = arith.constant 0 : index
    %8 = vector.load %arg6[%c0_15, %c0_16] : memref<1x32xf32, #tpu.memory_space<vmem>>, vector<1x32xf32>
    %c0_17 = arith.constant 0 : index
    %9 = memref.load %arg1[%c0_17] : memref<1xi32, #tpu.memory_space<smem>>
    %10 = tpu.iota {dimensions = array<i32: 1>} : vector<1x50xi32>
    %11 = vector.broadcast %9 : i32 to vector<1x50xi32>
    %12 = arith.cmpi eq, %10, %11 : vector<1x50xi32>
    %13 = arith.extui %12 : vector<1x50xi1> to vector<1x50xi32>
    %14 = arith.sitofp %13 : vector<1x50xi32> to vector<1x50xf32>
    %cst = arith.constant dense<0.000000e+00> : vector<1x32xf32>
    %15 = tpu.matmul %14, %0, %cst {dimension_numbers = #tpu.dot_dimension_numbers<[1], [0], [0], [1], [0, 0, 1, 1], [], []>} : vector<1x50xf32>, vector<50x32xf32>, vector<1x32xf32> -> vector<1x32xf32>
    %16 = tpu.concatenate %15, %7 in 1 : vector<1x32xf32>, vector<1x32xf32> -> vector<1x64xf32>
    %cst_18 = arith.constant dense<0.000000e+00> : vector<1x128xf32>
    %17 = tpu.matmul %16, %1, %cst_18 {dimension_numbers = #tpu.dot_dimension_numbers<[1], [0], [0], [1], [0, 0, 1, 1], [], []>} : vector<1x64xf32>, vector<64x128xf32>, vector<1x128xf32> -> vector<1x128xf32>
    %18 = arith.addf %17, %2 : vector<1x128xf32>
    %19 = vector.extract_strided_slice %18 {offsets = [0, 0], sizes = [1, 32], strides = [1, 1]} : vector<1x128xf32> to vector<1x32xf32>
    %20 = arith.negf %19 : vector<1x32xf32>
    %21 = math.exp %20 : vector<1x32xf32>
    %cst_19 = arith.constant 1.000000e+00 : f32
    %22 = vector.broadcast %cst_19 : f32 to vector<1x32xf32>
    %23 = arith.addf %22, %21 : vector<1x32xf32>
    %24 = arith.divf %22, %23 : vector<1x32xf32>
    %25 = vector.extract_strided_slice %18 {offsets = [0, 32], sizes = [1, 32], strides = [1, 1]} : vector<1x128xf32> to vector<1x32xf32>
    %26 = arith.negf %25 : vector<1x32xf32>
    %27 = math.exp %26 : vector<1x32xf32>
    %cst_20 = arith.constant 1.000000e+00 : f32
    %28 = vector.broadcast %cst_20 : f32 to vector<1x32xf32>
    %29 = arith.addf %28, %27 : vector<1x32xf32>
    %30 = arith.divf %28, %29 : vector<1x32xf32>
    %31 = vector.extract_strided_slice %18 {offsets = [0, 64], sizes = [1, 32], strides = [1, 1]} : vector<1x128xf32> to vector<1x32xf32>
    %32 = math.tanh %31 : vector<1x32xf32>
    %33 = vector.extract_strided_slice %18 {offsets = [0, 96], sizes = [1, 32], strides = [1, 1]} : vector<1x128xf32> to vector<1x32xf32>
    %34 = arith.negf %33 : vector<1x32xf32>
    %35 = math.exp %34 : vector<1x32xf32>
    %cst_21 = arith.constant 1.000000e+00 : f32
    %36 = vector.broadcast %cst_21 : f32 to vector<1x32xf32>
    %37 = arith.addf %36, %35 : vector<1x32xf32>
    %38 = arith.divf %36, %37 : vector<1x32xf32>
    %39 = arith.mulf %30, %8 : vector<1x32xf32>
    %40 = arith.mulf %24, %32 : vector<1x32xf32>
    %41 = arith.addf %39, %40 : vector<1x32xf32>
    %42 = math.tanh %41 : vector<1x32xf32>
    %43 = arith.mulf %38, %42 : vector<1x32xf32>
    %cst_22 = arith.constant dense<0.000000e+00> : vector<1x8xf32>
    %44 = tpu.matmul %43, %3, %cst_22 {dimension_numbers = #tpu.dot_dimension_numbers<[1], [1], [0], [0], [0, 0, 1, 0], [], []>} : vector<1x32xf32>, vector<8x32xf32>, vector<1x8xf32> -> vector<1x8xf32>
    %cst_23 = arith.constant dense<0xFF800000> : vector<1xf32>
    %45 = vector.multi_reduction <maximumf>, %44, %cst_23 [1] : vector<1x8xf32> to vector<1xf32>
    %46 = vector.shape_cast %45 : vector<1xf32> to vector<1x1xf32>
    %47 = vector.broadcast %46 : vector<1x1xf32> to vector<1x8xf32>
    %48 = arith.subf %44, %47 : vector<1x8xf32>
    %49 = math.exp %48 : vector<1x8xf32>
    %cst_24 = arith.constant dense<0.000000e+00> : vector<1xf32>
    %50 = vector.multi_reduction <add>, %49, %cst_24 [1] : vector<1x8xf32> to vector<1xf32>
    %51 = vector.shape_cast %50 : vector<1xf32> to vector<1x1xf32>
    %52 = tpu.reciprocal %51 : vector<1x1xf32> -> vector<1x1xf32>
    %53 = vector.broadcast %52 : vector<1x1xf32> to vector<1x8xf32>
    %54 = arith.mulf %49, %53 : vector<1x8xf32>
    %cst_25 = arith.constant dense<0.000000e+00> : vector<1x32xf32>
    %55 = tpu.matmul %54, %3, %cst_25 {dimension_numbers = #tpu.dot_dimension_numbers<[1], [0], [0], [1], [0, 0, 1, 1], [], []>} : vector<1x8xf32>, vector<8x32xf32>, vector<1x32xf32> -> vector<1x32xf32>
    %cst_26 = arith.constant dense<0.000000e+00> : vector<1x128xf32>
    %56 = tpu.matmul %43, %4, %cst_26 {dimension_numbers = #tpu.dot_dimension_numbers<[1], [0], [0], [1], [0, 0, 1, 1], [], []>} : vector<1x32xf32>, vector<32x128xf32>, vector<1x128xf32> -> vector<1x128xf32>
    %cst_27 = arith.constant dense<0.000000e+00> : vector<1x128xf32>
    %57 = tpu.matmul %55, %5, %cst_27 {dimension_numbers = #tpu.dot_dimension_numbers<[1], [0], [0], [1], [0, 0, 1, 1], [], []>} : vector<1x32xf32>, vector<32x128xf32>, vector<1x128xf32> -> vector<1x128xf32>
    %58 = arith.addf %56, %57 : vector<1x128xf32>
    %59 = arith.addf %58, %6 : vector<1x128xf32>
    %cst_28 = arith.constant dense<0xFF800000> : vector<1xf32>
    %60 = vector.multi_reduction <maximumf>, %59, %cst_28 [1] : vector<1x128xf32> to vector<1xf32>
    %61 = vector.shape_cast %60 : vector<1xf32> to vector<1x1xf32>
    %62 = vector.broadcast %61 : vector<1x1xf32> to vector<1x128xf32>
    %63 = arith.subf %59, %62 : vector<1x128xf32>
    %64 = math.exp %63 : vector<1x128xf32>
    %cst_29 = arith.constant dense<0.000000e+00> : vector<1xf32>
    %65 = vector.multi_reduction <add>, %64, %cst_29 [1] : vector<1x128xf32> to vector<1xf32>
    %66 = vector.shape_cast %65 : vector<1xf32> to vector<1x1xf32>
    %67 = math.log %66 : vector<1x1xf32>
    %68 = arith.addf %67, %61 : vector<1x1xf32>
    %69 = vector.broadcast %68 : vector<1x1xf32> to vector<1x128xf32>
    %70 = arith.subf %59, %69 : vector<1x128xf32>
    %c0_30 = arith.constant 0 : index
    %c0_31 = arith.constant 0 : index
    %71 = vector.load %arg11[%c0_30, %c0_31] : memref<1x128xf32, #tpu.memory_space<vmem>>, vector<1x128xf32>
    tpu.vector_store %arg11[%c0_30, %c0_31], %70 {strides = array<i32>} : memref<1x128xf32, #tpu.memory_space<vmem>>, vector<1x128xf32>,
    %c0_32 = arith.constant 0 : index
    %c0_33 = arith.constant 0 : index
    %72 = vector.load %arg14[%c0_32, %c0_33] : memref<1x8xf32, #tpu.memory_space<vmem>>, vector<1x8xf32>
    tpu.vector_store %arg14[%c0_32, %c0_33], %54 {strides = array<i32>} : memref<1x8xf32, #tpu.memory_space<vmem>>, vector<1x8xf32>,
    %c0_34 = arith.constant 0 : index
    %c0_35 = arith.constant 0 : index
    %73 = vector.load %arg12[%c0_34, %c0_35] : memref<1x32xf32, #tpu.memory_space<vmem>>, vector<1x32xf32>
    tpu.vector_store %arg12[%c0_34, %c0_35], %43 {strides = array<i32>} : memref<1x32xf32, #tpu.memory_space<vmem>>, vector<1x32xf32>,
    %c0_36 = arith.constant 0 : index
    %c0_37 = arith.constant 0 : index
    %74 = vector.load %arg13[%c0_36, %c0_37] : memref<1x32xf32, #tpu.memory_space<vmem>>, vector<1x32xf32>
    tpu.vector_store %arg13[%c0_36, %c0_37], %41 {strides = array<i32>} : memref<1x32xf32, #tpu.memory_space<vmem>>, vector<1x32xf32>,
    return
  }
  func.func @transform_0(%arg0: i32, %arg1: memref<1xi32, #tpu.memory_space<smem>>) -> (i32, i32) {
    %c0_i32 = arith.constant 0 : i32
    %c0_i32_0 = arith.constant 0 : i32
    %c0_i32_1 = arith.constant 0 : i32
    return %c0_i32, %c0_i32_0 : i32, i32
  }
  func.func @transform_1(%arg0: i32, %arg1: memref<1xi32, #tpu.memory_space<smem>>) -> (i32, i32) {
    %c0_i32 = arith.constant 0 : i32
    %c0_i32_0 = arith.constant 0 : i32
    %c0_i32_1 = arith.constant 0 : i32
    return %c0_i32, %c0_i32_0 : i32, i32
  }
  func.func @transform_2(%arg0: i32, %arg1: memref<1xi32, #tpu.memory_space<smem>>) -> (i32, i32) {
    %c0_i32 = arith.constant 0 : i32
    %c0_i32_0 = arith.constant 0 : i32
    %c0_i32_1 = arith.constant 0 : i32
    return %c0_i32, %c0_i32_0 : i32, i32
  }
  func.func @transform_3(%arg0: i32, %arg1: memref<1xi32, #tpu.memory_space<smem>>) -> (i32, i32) {
    %c0_i32 = arith.constant 0 : i32
    %c0_i32_0 = arith.constant 0 : i32
    %c0_i32_1 = arith.constant 0 : i32
    return %c0_i32, %c0_i32_0 : i32, i32
  }
  func.func @transform_4(%arg0: i32, %arg1: memref<1xi32, #tpu.memory_space<smem>>) -> (i32, i32) {
    %c0_i32 = arith.constant 0 : i32
    %c0_i32_0 = arith.constant 0 : i32
    %c0_i32_1 = arith.constant 0 : i32
    return %c0_i32, %c0_i32_0 : i32, i32
  }
  func.func @transform_5(%arg0: i32, %arg1: memref<1xi32, #tpu.memory_space<smem>>) -> (i32, i32) {
    %c0_i32 = arith.constant 0 : i32
    %c0_i32_0 = arith.constant 0 : i32
    %c0_i32_1 = arith.constant 0 : i32
    return %c0_i32, %c0_i32_0 : i32, i32
  }
  func.func @transform_6(%arg0: i32, %arg1: memref<1xi32, #tpu.memory_space<smem>>) -> (i32, i32) {
    %c0_i32 = arith.constant 0 : i32
    %c0_i32_0 = arith.constant 0 : i32
    %c0_i32_1 = arith.constant 0 : i32
    return %c0_i32, %c0_i32_0 : i32, i32
  }
  func.func @transform_7(%arg0: i32, %arg1: memref<1xi32, #tpu.memory_space<smem>>) -> (i32, i32) {
    %c0_i32 = arith.constant 0 : i32
    %c0_i32_0 = arith.constant 0 : i32
    %c0_i32_1 = arith.constant 0 : i32
    return %c0_i32, %c0_i32_0 : i32, i32
  }
  func.func @transform_8(%arg0: i32, %arg1: memref<1xi32, #tpu.memory_space<smem>>) -> (i32, i32) {
    %c0_i32 = arith.constant 0 : i32
    %c0_i32_0 = arith.constant 0 : i32
    %c0_i32_1 = arith.constant 0 : i32
    return %c0_i32, %c0_i32_0 : i32, i32
  }
  func.func @transform_9(%arg0: i32, %arg1: memref<1xi32, #tpu.memory_space<smem>>) -> (i32, i32) {
    %c0_i32 = arith.constant 0 : i32
    %c0_i32_0 = arith.constant 0 : i32
    %c0_i32_1 = arith.constant 0 : i32
    return %c0_i32, %c0_i32_0 : i32, i32
  }
  func.func @transform_10(%arg0: i32, %arg1: memref<1xi32, #tpu.memory_space<smem>>) -> (i32, i32) {
    %c0_i32 = arith.constant 0 : i32
    %c0_i32_0 = arith.constant 0 : i32
    %c0_i32_1 = arith.constant 0 : i32
    return %c0_i32, %c0_i32_0 : i32, i32
  }
  func.func @transform_11(%arg0: i32, %arg1: memref<1xi32, #tpu.memory_space<smem>>) -> (i32, i32) {
    %c0_i32 = arith.constant 0 : i32
    %c0_i32_0 = arith.constant 0 : i32
    %c0_i32_1 = arith.constant 0 : i32
    return %c0_i32, %c0_i32_0 : i32, i32
  }
  func.func @transform_12(%arg0: i32, %arg1: memref<1xi32, #tpu.memory_space<smem>>) -> (i32, i32) {
    %c0_i32 = arith.constant 0 : i32
    %c0_i32_0 = arith.constant 0 : i32
    %c0_i32_1 = arith.constant 0 : i32
    return %c0_i32, %c0_i32_0 : i32, i32
  }
}

</mosaic_0001>

<bundles_post_ra>
// kernel: tpu_custom_call.1
= control target key start
LH: loop header
LB: loop body
LE: loop exit
PB: predicated region body
PF: predicated region fallthrough
CT: control target
= control target key end

     0   :  { %20 = vsyncpa [#allocation5], 0  ;;  %s1286_s0 = inlined_call_operand.<no memory space> [shape: s32[1], index: 0, kind: input, shape index: {}]   ;;  %s1287_s1 = inlined_call_operand.vmem [shape: f32[50,32], index: 1, kind: input, shape index: {}]   ;;  %s1288_s2 = inlined_call_operand.vmem [shape: f32[64,128], index: 2, kind: input, shape index: {}]   ;;  %s1289_s3 = inlined_call_operand.vmem [shape: f32[1,128], index: 3, kind: input, shape index: {}]   ;;  %s1290_s4 = inlined_call_operand.vmem [shape: f32[1,32], index: 4, kind: input, shape index: {}]   ;;  %s1291_s5 = inlined_call_operand.hbm [shape: f32[1,32], index: 5, kind: input, shape index: {}]   ;;  %s1292_s6 = inlined_call_operand.vmem [shape: f32[8,32], index: 6, kind: input, shape index: {}]   ;;  %s1293_s7 = inlined_call_operand.vmem [shape: f32[32,128], index: 7, kind: input, shape index: {}]   ;;  %s1294_s8 = inlined_call_operand.hbm [shape: f32[32,128], index: 8, kind: input, shape index: {}]   ;;  %s1295_s9 = inlined_call_operand.vmem [shape: f32[1,128], index: 9, kind: input, shape index: {}]   ;;  %s1296_s10 = inlined_call_operand.hbm [shape: f32[1,128], index: 10, kind: output, shape index: {0}]   ;;  %s1297_s11 = inlined_call_operand.hbm [shape: f32[1,32], index: 11, kind: output, shape index: {1}]   ;;  %s1298_s12 = inlined_call_operand.hbm [shape: f32[1,32], index: 12, kind: output, shape index: {2}]   ;;  %s1299_s13 = inlined_call_operand.hbm [shape: f32[1,8], index: 13, kind: output, shape index: {3}]  }
   0x1   :  { %21 = vsyncpa [#allocation8], 0 }
   0x2   :  { %22 = vsyncpa [#allocation6], 0 }
   0x3   :  { %23 = vsyncpa [#allocation11], 0 }
   0x4   :  { %24 = vsyncpa [#allocation14], 0  ;;  %s1001_s25 = smov [#allocation4]   ;;  %s1002_s27 = smov [#allocation7]  }
   0x5   :  { %s39_s26 = sshll.u32 %s1001_s25, 4  ;;  %s52_s28 = sshll.u32 %s1002_s27, 4  ;;  %s40_s26 = int_to_ptr.vmem [resolvable:$true] %s39_s26  ;;  %s1085_s28 = int_to_ptr.vmem [resolvable:$true] %s52_s28 }
   0x6   :  { %s859_s14 = scalar_lea.hbm %s1291_s5, 16 }
   0x7   :  { %p860_p0 = scmp.ne.s32.totalorder %s1291_s5, %s859_s14  ;;  %p863_p1 = scmp.lt.u32.totalorder %s859_s14, %s1291_s5 }
   0x9   :  { %p865_p2 = pnand %p863_p1, %p860_p0 }
   0xb   :  { %868 = shalt.err (!%p865_p2)
}
   0xc   :  { %s869_s19 = scalar_lea.vmem %s40_s26, 16  ;;  %s873_s20 = scalar_lea.vmem %s40_s26, 32 }
   0xd   :  { %p870_p3 = scmp.ne.s32.totalorder %s40_s26, %s869_s19  ;;  %p874_p4 = scmp.lt.s32.totalorder %s40_s26, %s40_s26 }
   0xe   :  { %p875_p5 = scmp.lt.s32.totalorder %s873_s20, %s869_s19 }
  0x10   :  { %p876_p6 = por %p875_p5, %p874_p4 }
  0x12   :  { %p877_p7 = pnand %p876_p6, %p870_p3 }
  0x14   :  { %880 = shalt.err (!%p877_p7)
}
  0x15   :  { %42 = dma.hbm_to_vmem [thread:$0]  %s1291_s5, 16, %s40_s26, [#allocation5]  }
  0x16   :  { %s881_s25 = scalar_lea.hbm %s1294_s8, 512 }
  0x17   :  { %p882_p8 = scmp.ne.s32.totalorder %s1294_s8, %s881_s25  ;;  %p885_p9 = scmp.lt.u32.totalorder %s881_s25, %s1294_s8 }
  0x19   :  { %p887_p10 = pnand %p885_p9, %p882_p8 }
  0x1b   :  { %890 = shalt.err (!%p887_p10)
}
  0x1c   :  { %s891_s15 = scalar_lea.vmem %s1085_s28, 512  ;;  %p896_p12 = scmp.lt.s32.totalorder %s1085_s28, %s1085_s28 }
  0x1d   :  { %p892_p11 = scmp.ne.s32.totalorder %s1085_s28, %s891_s15  ;;  %p897_p13 = scmp.lt.s32.totalorder %s891_s15, %s891_s15 }
  0x1f   :  { %p898_p0 = por %p897_p13, %p896_p12 }
  0x21   :  { %p899_p1 = pnand %p898_p0, %p892_p11 }
  0x23   :  { %902 = shalt.err (!%p899_p1)
}
  0x24   :  { %s1003_s5 = smov 128   ;;  %s1004_s26 = smov 8  }
  0x25   :  { %58 = dma.hbm_to_vmem [thread:$0]  %s1294_s8, 512, %s1085_s28, [#allocation8], %s1003_s5, %s1003_s5, %s1004_s26  }
  0x26   :  { %991 = dma.done.wait [#allocation5], 16  }
  0x27   :  { %992 = vsyncadd [#allocation5], 4294967280 }
  0x28   :  { %993 = dma.done.wait [#allocation8], 512  }
  0x29   :  { %994 = vsyncadd [#allocation8], 4294966784  ;;  %v1005_v0 = vmov 0.0|0.0   ;;  %vm1006_vm0 = vmmov 0   ;;  %v1007_v1 = vmov 0.0   ;;  %v67_v2 = vld [vmem:[%s1287_s1] sm:$0xff]  ;;  %v96_v7 = vlaneseq }
  0x2a   :  { %796 = vmatprep.subr.bf16.mxu0 %v1005_v0  ;;  %742 = vmatprep.mubr.msk.f32.mxu0 %vm1006_vm0, %v1007_v1  ;;  %v68_v3 = vld [vmem:[%s1287_s1 + $0x8] sm:$0xff]  ;;  %v69_v4 = vld [vmem:[%s1287_s1 + $0x10] sm:$0xff]  ;;  %v70_v6 = vld [vmem:[%s1287_s1 + $0x18] sm:$0xff]  ;;  %s1008_s30 = smov 32   ;;  %v98_v20 = vstv %s1286_s0  ;;  %vm106_vm2 = vcmask 1041408   ;;  %vm102_vm3 = vcmask 408576  }
  0x2b   :  { %805 = vmatprep.subr.bf16.mxu1 %v1005_v0  ;;  %761 = vmatprep.mubr.msk.f32.mxu1 %vm1006_vm0, %v1007_v1  ;;  %v797_v5 = vpack.c.bf16 %v68_v3, %v67_v2  ;;  %v688_v8 = vld [vmem:[%s1290_s4] ss:$0 sm:$0xff]  ;;  %v800_v10 = vpack.c.bf16 %v70_v6, %v69_v4  ;;  %v75_v11 = vld [vmem:[%s1288_s2 + $0x8] sm:$0xff]  ;;  %v76_v12 = vld [vmem:[%s1288_s2 + $0x10] sm:$0xff]  ;;  %v97_v17 = vand.u32 127, %v96_v7  ;;  %vm188_vm4 = vcmask 261120  }
  0x2c   :  { %v74_v9 = vld [vmem:[%s1288_s2] sm:$0xff]  ;;  %185 = vrot.lane.b32.xlu0 %v688_v8, %s1008_s30  ;;  %v77_v13 = vld [vmem:[%s1288_s2 + $0x18] sm:$0xff]  ;;  %v72_v15 = vld [vmem:[%s1287_s1 + $0x28] sm:$0xff]  ;;  %vm190_vm5 = vcmask 523264   ;;  %s1009_s5 = smov 64   ;;  %vm621_vm6 = vcmask 253952  }
  0x2d   :  { %798 = vmatpush3.bf16.msra.mxu0 %v797_v5  ;;  %v71_v14 = vld [vmem:[%s1287_s1 + $0x20] sm:$0xff]  ;;  %v806_v16 = vpack.c.bf16 %v75_v11, %v74_v9  ;;  %v809_v18 = vpack.c.bf16 %v77_v13, %v76_v12  ;;  %v79_v22 = vld [vmem:[%s1288_s2 + $0x28] sm:$0xff]  ;;  %vm99_vm1 = vcmp.eq.s32.totalorder %v97_v17, %v98_v20  ;;  %v80_v24 = vld [vmem:[%s1288_s2 + $0x30] sm:$0xff]  ;;  %vm374_vm7 = vcmask 57344  }
  0x2e   :  { %799 = vmatprep.subr.bf16.mxu0 %v1005_v0  ;;  %v803_v19 = vpack.c.bf16 %v72_v15, %v71_v14  ;;  %v78_v21 = vld [vmem:[%s1288_s2 + $0x20] sm:$0xff]  ;;  %v81_v25 = vld [vmem:[%s1288_s2 + $0x38] sm:$0xff]  ;;  %v73_v26 = vld [vmem:[%s1287_s1 + $0x30] sm:$0x3]  ;;  %v685_v27 = vsel %vm99_vm1, 1.0, %v1007_v1  ;;  %vm386_vm8 = vcmask 64512  }
  0x2f   :  { %807 = vmatpush3.bf16.msra.mxu1 %v806_v16  ;;  %v812_v23 = vpack.c.bf16 %v79_v22, %v78_v21  ;;  %v815_v28 = vpack.c.bf16 %v81_v25, %v80_v24  ;;  %v691_v29 = vld [vmem:[#allocation4] ss:$0 sm:$0xff]  ;;  %v88_v62 = vld [vmem:[#allocation7] sm:$0xff]  ;;  %v89_v63 = vld [vmem:[#allocation7 + $0x8] sm:$0xff]  ;;  %vm604_vm9 = vcmask 1040384  }
  0x30   :  { %808 = vmatprep.subr.bf16.mxu1 %v1005_v0  ;;  %276 = vrot.lane.b32.xlu1 %v691_v29, %s1008_s30  ;;  %v82_v34 = vld [vmem:[%s1289_s3] sm:$0x1]  ;;  %v90_v2 = vld [vmem:[#allocation7 + $0x10] sm:$0xff]  ;;  %v818_v3 = vpack.c.bf16 %v89_v63, %v88_v62  ;;  %v85_v9 = vld [vmem:[%s1293_s7 + $0x8] sm:$0xff] }
  0x31   :  { %801 = vmatpush3.bf16.msra.mxu0 %v800_v10  ;;  %v83_v49 = vld [vmem:[%s1292_s6] sm:$0xff]  ;;  %s1010_s6 = smov 96   ;;  %v86_v13 = vld [vmem:[%s1293_s7 + $0x10] sm:$0xff]  ;;  %v87_v14 = vld [vmem:[%s1293_s7 + $0x18] sm:$0xff] }
  0x32   :  { %802 = vmatprep.subr.bf16.mxu0 %v1005_v0  ;;  %v91_v4 = vld [vmem:[#allocation7 + $0x18] sm:$0xff]  ;;  %v827_v15 = vpack.c.bf16 %v87_v14, %v86_v13 }
  0x33   :  { %810 = vmatpush3.bf16.msra.mxu1 %v809_v18  ;;  %v821_v5 = vpack.c.bf16 %v91_v4, %v90_v2  ;;  %v84_v8 = vld [vmem:[%s1293_s7] sm:$0xff] }
  0x34   :  { %811 = vmatprep.subr.bf16.mxu1 %v1005_v0  ;;  %v824_v11 = vpack.c.bf16 %v85_v9, %v84_v8  ;;  %v92_v20 = vld [vmem:[%s1295_s9] sm:$0x1]  ;;  %s1011_s9 = smov [#allocation10]  }
  0x35   :  { %804 = vmatpush3.bf16.msra.mxu0 %v803_v19  ;;  %s644_s21 = sshll.u32 %s1011_s9, 4  ;;  %s645_s21 = int_to_ptr.vmem [resolvable:$true] %s644_s21 }
  0x36   :  { %740 = vmatprep.subr.mxu0 %v1007_v1  ;;  %s903_s22 = scalar_lea.vmem %s645_s21, 16  ;;  %s907_s23 = scalar_lea.vmem %s645_s21, 32 }
  0x37   :  { %813 = vmatpush3.bf16.msra.mxu1 %v812_v23  ;;  %p904_p2 = scmp.ne.s32.totalorder %s645_s21, %s903_s22  ;;  %p908_p3 = scmp.lt.s32.totalorder %s645_s21, %s645_s21 }
  0x38   :  { %814 = vmatprep.subr.bf16.mxu1 %v1005_v0  ;;  %p909_p4 = scmp.lt.s32.totalorder %s907_s23, %s903_s22 }
  0x39   :  { %741 = vmatpush3.msk.msra.mxu0 %vm106_vm2, %v73_v26 }
  0x3a   :  { %743 = vmatmul.mubr.msk.f32.vlgmr.msra.gmra.mrb[0].mxu0 %vm102_vm3, %v685_v27  ;;  %764 = vmatprep.subr.mxu0 %v1007_v1  ;;  %p910_p5 = por %p909_p4, %p908_p3 }
  0x3b   :  { %766 = vmatprep.mubr.msk.f32.mxu0 %vm1006_vm0, %v1007_v1  ;;  %816 = vmatpush3.bf16.msra.mxu1 %v815_v28 }
  0x3c   :  { %769 = vmatprep.subr.mxu1 %v1007_v1  ;;  %p911_p6 = pnand %p910_p5, %p904_p2 }
  0x40   :  { %765 = vmatpush3.xpose.msk.msra.mxu0 %vm188_vm4, %v83_v49 }
  0x41   :  { %817 = vmatprep.subr.bf16.mxu0 %v1005_v0 }
  0x9e   :  { %v186_v30 = vpop.permute.xlu0 %185 }
  0xa2   :  { %v277_v45 = vpop.permute.xlu1 %276 }
 0x10d   :  { %v176_v31 = vpop.f32.mrb[0].mxu0 }
 0x10e   :  { %v189_v32 = vsel %vm188_vm4, %v176_v31, %v186_v30  ;;  %v744_v33 = vpop.f32.mrb[1].mxu0 }
 0x10f   :  { %762 = vmatmul.mubr.msk.f32.vlgmr.msra.gmra.mrb[0].mxu1 %vm190_vm5, %v189_v32 }
 0x110   :  { %771 = vmatprep.mubr.msk.f32.mxu1 %vm1006_vm0, %v1007_v1  ;;  %770 = vmatpush3.msra.mxu1 %v83_v49 }
 0x111   :  { %823 = vmatprep.subr.bf16.mxu1 %v1005_v0 }
 0x1e2   :  { %v260_v35 = vpop.f32.mrb[0].mxu1 }
 0x1e3   :  { %v261_v36 = vadd.f32 %v260_v35, %v82_v34  ;;  %v763_v37 = vpop.f32.mrb[1].mxu1 }
 0x1e5   :  { %843 = vtanh.f32 %v261_v36  ;;  %v690_v39 = vmul.f32 -1.442695, %v261_v36 }
 0x1e7   :  { %845 = vpow2.f32 %v690_v39 }
 0x1ef   :  { %v844_v38 = vpop.eup %843 }
 0x1f0   :  { %281 = vrot.lane.b32.xlu0 %v844_v38, %s1009_s5 }
 0x1f1   :  { %v846_v40 = vpop.eup %845 }
 0x1f2   :  { %v267_v41 = vadd.f32 1.0, %v846_v40 }
 0x1f4   :  { %847 = vrcp.f32 %v267_v41 }
 0x1fe   :  { %v848_v42 = vpop.eup %847 }
 0x1ff   :  { %v279_v46 = vmul.f32 %v848_v42, %v277_v45 }
 0x262   :  { %v282_v43 = vpop.permute.xlu0 %281 }
 0x263   :  { %v284_v44 = vmul.f32 %v848_v42, %v282_v43 }
 0x265   :  { %286 = vrot.lane.b32.xlu1 %v284_v44, %s1008_s30 }
 0x2d7   :  { %v287_v47 = vpop.permute.xlu1 %286 }
 0x2d8   :  { %v289_v48 = vadd.f32 %v287_v47, %v279_v46 }
 0x2da   :  { %849 = vtanh.f32 %v289_v48 }
 0x2e4   :  { %v850_v50 = vpop.eup %849 }
 0x2e5   :  { %292 = vrot.lane.b32.xlu0 %v850_v50, %s1009_s5 }
 0x357   :  { %v293_v51 = vpop.permute.xlu0 %292 }
 0x358   :  { %v295_v52 = vmul.f32 %v848_v42, %v293_v51 }
 0x35a   :  { %297 = vrot.lane.b32.xlu1 %v295_v52, %s1008_s30 }
 0x3cc   :  { %v298_v53 = vpop.permute.xlu1 %297 }
 0x3cd   :  { %767 = vmatmul.mubr.msk.f32.vlgmr.msra.gmra.mrb[2].mxu0 %vm188_vm4, %v298_v53  ;;  %622 = vst.msk [vmem:[#allocation10] sm:$0x1] %vm621_vm6, %v298_v53 }
 0x3ce   :  { %782 = vmatprep.mubr.msk.f32.mxu0 %vm1006_vm0, %v1007_v1  ;;  %819 = vmatpush3.bf16.msra.mxu0 %v818_v3 }
 0x3cf   :  { %820 = vmatprep.subr.bf16.mxu0 %v1005_v0 }
 0x3d2   :  { %822 = vmatpush3.bf16.msra.mxu0 %v821_v5 }
 0x4a0   :  { %v370_v54 = vpop.f32.mrb[2].mxu0 }
 0x4a1   :  { %v768_v55 = vpop.f32.mrb[3].mxu0  ;;  %v375_v56 = vsel %vm374_vm7, %v370_v54, -inf }
 0x4a2   :  { %376 = vmax.xlane.f32.xlu0 %v375_v56 }
 0x52f   :  { %v377_v57 = vpop.xlane.xlu0 %376 }
 0x530   :  { %v378_v58 = vsub.f32 %v370_v54, %v377_v57 }
 0x532   :  { %v379_v59 = vmul.f32 1.442695, %v378_v58 }
 0x534   :  { %851 = vpow2.f32 %v379_v59 }
 0x53e   :  { %v852_v60 = vpop.eup %851 }
 0x53f   :  { %v381_v61 = vsel %vm374_vm7, %v852_v60, 0.0 }
 0x540   :  { %382 = vadd.xlane.f32.xlu1 %v381_v61 }
 0x551   :  { %624 = vrot.lane.b32.xlu1 %v289_v48, %s1010_s6 }
 0x5cd   :  { %v383_v6 = vpop.xlane.xlu1 %382 }
 0x5ce   :  { %853 = vrcp.f32 %v383_v6 }
 0x5d1   :  { %v625_v7 = vpop.permute.xlu1 %624 }
 0x5d2   :  { %627 = vst.msk [vmem:[#allocation12] sm:$0x1] %vm621_vm6, %v625_v7 }
 0x5d8   :  { %v854_v10 = vpop.eup %853 }
 0x5d9   :  { %v385_v12 = vmul.f32 %v854_v10, %v852_v60 }
 0x5db   :  { %619 = vst.msk [vmem:[#allocation13] sm:$0x1] %vm374_vm7, %v385_v12  ;;  %772 = vmatmul.mubr.msk.f32.vlgmr.msra.gmra.mrb[2].mxu1 %vm386_vm8, %v385_v12 }
 0x5dc   :  { %825 = vmatpush3.bf16.msra.mxu1 %v824_v11  ;;  %793 = vmatprep.mubr.msk.f32.mxu1 %vm1006_vm0, %v1007_v1 }
 0x5dd   :  { %826 = vmatprep.subr.bf16.mxu1 %v1005_v0 }
 0x5e0   :  { %828 = vmatpush3.bf16.msra.mxu1 %v827_v15 }
 0x5e3   :  { %794 = vmatmul.mubr.msk.f32.vlgmr.msra.gmra.mrb[4].mxu1 %vm188_vm4, %v298_v53 }
 0x6ae   :  { %v456_v16 = vpop.f32.mrb[2].mxu1 }
 0x6af   :  { %v773_v17 = vpop.f32.mrb[3].mxu1  ;;  %783 = vmatmul.mubr.msk.f32.vlgmr.msra.gmra.mrb[4].mxu0 %vm188_vm4, %v456_v16 }
 0x6b6   :  { %v599_v18 = vpop.f32.mrb[4].mxu1 }
 0x6b7   :  { %v795_v19 = vpop.f32.mrb[5].mxu1 }
 0x782   :  { %v529_v21 = vpop.f32.mrb[4].mxu0 }
 0x783   :  { %v600_v22 = vadd.f32 %v599_v18, %v529_v21  ;;  %v784_v23 = vpop.f32.mrb[5].mxu0 }
 0x785   :  { %v1229_v1 = vadd.f32 %v600_v22, %v92_v20 }
 0x787   :  { %v605_v0 = vsel %vm604_vm9, %v1229_v1, -inf }
 0x788   :  { %606 = vmax.xlane.f32.xlu0 %v605_v0 }
 0x815   :  { %v1232_v24 = vpop.xlane.xlu0 %606 }
 0x816   :  { %v608_v25 = vsub.f32 %v1229_v1, %v1232_v24 }
 0x818   :  { %v609_v26 = vmul.f32 1.442695, %v608_v25 }
 0x81a   :  { %855 = vpow2.f32 %v609_v26 }
 0x824   :  { %v856_v27 = vpop.eup %855 }
 0x825   :  { %v611_v28 = vsel %vm604_vm9, %v856_v27, 0.0 }
 0x826   :  { %612 = vadd.xlane.f32.xlu0 %v611_v28 }
 0x827   :  { %914 = shalt.err (!%p911_p6)
}
 0x828   :  { %s915_s0 = scalar_lea.hbm %s1297_s11, 16 }
 0x829   :  { %p916_p7 = scmp.ne.s32.totalorder %s1297_s11, %s915_s0  ;;  %p919_p8 = scmp.lt.u32.totalorder %s915_s0, %s1297_s11 }
 0x82b   :  { %p921_p9 = pnand %p919_p8, %p916_p7 }
 0x82d   :  { %924 = shalt.err (!%p921_p9)
}
 0x82e   :  { %647 = dma.vmem_to_hbm [thread:$0]  %s645_s21, 16, %s1297_s11, [#allocation11]  }
 0x82f   :  { %s1012_s5 = smov [#allocation12]  }
 0x830   :  { %s654_s3 = sshll.u32 %s1012_s5, 4  ;;  %s655_s3 = int_to_ptr.vmem [resolvable:$true] %s654_s3 }
 0x831   :  { %s925_s26 = scalar_lea.vmem %s655_s3, 16  ;;  %s929_s6 = scalar_lea.vmem %s655_s3, 32 }
 0x832   :  { %p926_p10 = scmp.ne.s32.totalorder %s655_s3, %s925_s26  ;;  %p930_p11 = scmp.lt.s32.totalorder %s655_s3, %s655_s3 }
 0x833   :  { %p931_p12 = scmp.lt.s32.totalorder %s929_s6, %s925_s26 }
 0x835   :  { %p932_p13 = por %p931_p12, %p930_p11 }
 0x837   :  { %p933_p0 = pnand %p932_p13, %p926_p10 }
 0x839   :  { %936 = shalt.err (!%p933_p0)
}
 0x83a   :  { %s937_s17 = scalar_lea.hbm %s1298_s12, 16 }
 0x83b   :  { %p938_p1 = scmp.ne.s32.totalorder %s1298_s12, %s937_s17  ;;  %p941_p2 = scmp.lt.u32.totalorder %s937_s17, %s1298_s12 }
 0x83d   :  { %p943_p3 = pnand %p941_p2, %p938_p1 }
 0x83f   :  { %946 = shalt.err (!%p943_p3)
}
 0x840   :  { %657 = dma.vmem_to_hbm [thread:$0]  %s655_s3, 16, %s1298_s12, [#allocation11]  }
 0x841   :  { %s1013_s7 = smov [#allocation13]  }
 0x842   :  { %s664_s20 = sshll.u32 %s1013_s7, 4  ;;  %s665_s20 = int_to_ptr.vmem [resolvable:$true] %s664_s20 }
 0x843   :  { %s947_s9 = scalar_lea.vmem %s665_s20, 16  ;;  %s951_s21 = scalar_lea.vmem %s665_s20, 32 }
 0x844   :  { %p948_p4 = scmp.ne.s32.totalorder %s665_s20, %s947_s9  ;;  %p952_p5 = scmp.lt.s32.totalorder %s665_s20, %s665_s20 }
 0x845   :  { %p953_p6 = scmp.lt.s32.totalorder %s951_s21, %s947_s9 }
 0x847   :  { %p954_p7 = por %p953_p6, %p952_p5 }
 0x849   :  { %p955_p8 = pnand %p954_p7, %p948_p4 }
 0x84b   :  { %958 = shalt.err (!%p955_p8)
}
 0x84c   :  { %s959_s24 = scalar_lea.hbm %s1299_s13, 16 }
 0x84d   :  { %p960_p9 = scmp.ne.s32.totalorder %s1299_s13, %s959_s24  ;;  %p963_p10 = scmp.lt.u32.totalorder %s959_s24, %s1299_s13 }
 0x84f   :  { %p965_p11 = pnand %p963_p10, %p960_p9 }
 0x851   :  { %968 = shalt.err (!%p965_p11)
}
 0x852   :  { %667 = dma.vmem_to_hbm [thread:$0]  %s665_s20, 16, %s1299_s13, [#allocation14]  }
 0x853   :  { %s1014_s15 = smov [#allocation9]  }
 0x854   :  { %s634_s1 = sshll.u32 %s1014_s15, 4  ;;  %s635_s1 = int_to_ptr.vmem [resolvable:$true] %s634_s1 }
 0x855   :  { %s969_s2 = scalar_lea.vmem %s635_s1, 16  ;;  %s973_s5 = scalar_lea.vmem %s635_s1, 32 }
 0x856   :  { %p970_p12 = scmp.ne.s32.totalorder %s635_s1, %s969_s2  ;;  %p974_p13 = scmp.lt.s32.totalorder %s635_s1, %s635_s1 }
 0x857   :  { %p975_p0 = scmp.lt.s32.totalorder %s973_s5, %s969_s2 }
 0x859   :  { %p976_p1 = por %p975_p0, %p974_p13 }
 0x85b   :  { %p977_p2 = pnand %p976_p1, %p970_p12 }
 0x8b3   :  { %v613_v29 = vpop.xlane.xlu0 %612 }
 0x8b4   :  { %857 = vlog2.f32 %v613_v29 }
 0x8be   :  { %v858_v30 = vpop.eup %857 }
 0x8bf   :  { %v615_v31 = vmul.f32 0.6931472, %v858_v30 }
 0x8c1   :  { %v616_v32 = vadd.f32 %v615_v31, %v1232_v24 }
 0x8c3   :  { %v617_v33 = vsub.f32 %v1229_v1, %v616_v32 }
 0x8c5   :  { %618 = vst [vmem:[#allocation9] sm:$0x1] %v617_v33 }
 0x8c6   :  { %980 = shalt.err (!%p977_p2)
}
 0x8c7   :  { %s981_s26 = scalar_lea.hbm %s1296_s10, 16 }
 0x8c8   :  { %p982_p3 = scmp.ne.s32.totalorder %s1296_s10, %s981_s26  ;;  %p985_p4 = scmp.lt.u32.totalorder %s981_s26, %s1296_s10 }
 0x8ca   :  { %p987_p5 = pnand %p985_p4, %p982_p3 }
 0x8cc   :  { %990 = shalt.err (!%p987_p5)
}
 0x8cd   :  { %637 = dma.vmem_to_hbm [thread:$0]  %s635_s1, 16, %s1296_s10, [#allocation6]  }
 0x8ce   :  { %995 = dma.done.wait [#allocation6], 16  }
 0x8cf   :  { %996 = vsyncadd [#allocation6], 4294967280 }
 0x8d0   :  { %997 = dma.done.wait [#allocation11], 32  }
 0x8d1   :  { %998 = vsyncadd [#allocation11], 4294967264 }
 0x8d2   :  { %999 = dma.done.wait [#allocation14], 16  }
 0x8d3   :  { %1000 = vsyncadd [#allocation14], 4294967280 }
 0x8d4   :  { %680 = vsyncpa [#allocation5], 1 }
 0x8d5   :  { %681 = vsyncpa [#allocation8], 1 }
 0x8d6   :  { %682 = vsyncpa [#allocation6], 1 }
 0x8d7   :  { %683 = vsyncpa [#allocation11], 1 }
 0x8d8   :  { %684 = vsyncpa [#allocation14], 1 }

</bundles_post_ra>
